<compile_context>
chip_gen: v6e
topology: v6e:2x2x1
jax: 0.10.0
libtpu: 0.0.40
codegen_flags: <defaults>
</compile_context>

<pallas_src>
import jax
import jax.numpy as jnp
from jax import lax
from jax.experimental import pallas as pl
from jax.experimental.pallas import tpu as pltpu

F32 = jnp.float32
BF16 = jnp.bfloat16


# ----------------------------------------------------------------------------
# Fused BasicBlock kernel: one grid step == Bb samples, flattened to M = Bb*L
# ----------------------------------------------------------------------------
def _make_basic_block_kernel(Bb, L, c_in, c_out, has_proj, out_dtype):
    M = Bb * L

    def conv3(h_bf16, w_ref):
        # y[p] = h[p-1] @ w[0] + h[p] @ w[1] + h[p+1] @ w[2]   (zero-padded edges)
        # Shifted-partial-product form: 3 aligned bf16 matmuls (MXU, f32 acc),
        # then sublane rolls (XLU slot) of the f32 results with edge masks.  The
        # masks also stop leakage between samples inside the flattened M axis.
        q0 = jnp.dot(h_bf16, w_ref[0], preferred_element_type=F32)
        q1 = jnp.dot(h_bf16, w_ref[1], preferred_element_type=F32)
        q2 = jnp.dot(h_bf16, w_ref[2], preferred_element_type=F32)
        pos = lax.broadcasted_iota(jnp.int32, (M, 1), 0) % L
        down = jnp.where(pos == 0, 0.0, pltpu.roll(q0, 1, 0))        # q0[p-1]
        up = jnp.where(pos == L - 1, 0.0, pltpu.roll(q2, M - 1, 0))  # q2[p+1]
        return down + q1 + up

    def body(x_ref, w1_ref, b1_ref, w2_ref, b2_ref, o_ref, residual_fn):
        x = x_ref[...].reshape(M, c_in)          # input dtype (f32 or bf16)
        xb = x.astype(BF16)                      # MXU feed
        h1 = jnp.maximum(conv3(xb, w1_ref) + b1_ref[...], 0.0)
        h2 = jnp.maximum(conv3(h1.astype(BF16), w2_ref) + b2_ref[...], 0.0)
        y = h2 + residual_fn(x, xb)
        o_ref[...] = y.astype(out_dtype).reshape(Bb, L, c_out)

    if has_proj:
        def kernel(x_ref, w1_ref, b1_ref, w2_ref, b2_ref, wr_ref, br_ref, o_ref):
            body(x_ref, w1_ref, b1_ref, w2_ref, b2_ref, o_ref,
                 lambda x, xb: jnp.dot(xb, wr_ref[...],
                                       preferred_element_type=F32) + br_ref[...])
    else:
        def kernel(x_ref, w1_ref, b1_ref, w2_ref, b2_ref, o_ref):
            body(x_ref, w1_ref, b1_ref, w2_ref, b2_ref, o_ref,
                 lambda x, xb: x.astype(F32))    # identity skip stays f32
    return kernel


# ----------------------------------------------------------------------------
# Block-batch heuristic
# ----------------------------------------------------------------------------
def _choose_block_batch(B, L, c_in, c_out, x_bytes, out_bytes):
    """Samples per grid step: fill the MXU (M = Bb*L ~ 512 rows), stay well under
    v7x's VMEM (default 32 MiB scoped), keep >=2 grid steps when B allows so both
    v7x TensorCores get work, and make Bb divide B exactly."""
    bb = max(1, 512 // max(L, 1))
    # VMEM guard: ~8 MiB for double-buffered in/out blocks + f32 intermediates.
    per_sample = L * (c_in * (2 * x_bytes + 8) + c_out * (2 * out_bytes + 20))
    bb = min(bb, max(1, (8 << 20) // max(per_sample, 1)), B)
    half = (B + 1) // 2
    if B >= 2 and bb > half and half * L >= 128:
        bb = half
    while B % bb:
        bb -= 1
    return bb


# ----------------------------------------------------------------------------
# Forward wrappers
# ----------------------------------------------------------------------------
def basic_block_forward_channels_last(params, x, *, out_dtype=BF16,
                                      block_batch=None):
    """Fast path: x (B, L, C_in) channels-last (f32 or bf16) -> (B, L, C_out).
    No host-side pad/transpose passes; halo handled inside the kernel."""
    B, L, c_in = x.shape
    c_out = params["w1"].shape[-1]
    has_proj = "wr" in params
    out_dtype = jnp.dtype(out_dtype)
    Bb = block_batch or _choose_block_batch(
        B, L, c_in, c_out, x.dtype.itemsize, out_dtype.itemsize)

    full2 = lambda b: (0, 0)
    full3 = lambda b: (0, 0, 0)
    in_specs = [
        pl.BlockSpec((Bb, L, c_in), lambda b: (b, 0, 0)),
        pl.BlockSpec((3, c_in, c_out), full3),
        pl.BlockSpec((1, c_out), full2),
        pl.BlockSpec((3, c_out, c_out), full3),
        pl.BlockSpec((1, c_out), full2),
    ]
    args = [x, params["w1"], params["b1"], params["w2"], params["b2"]]
    if has_proj:
        in_specs += [pl.BlockSpec((c_in, c_out), full2),
                     pl.BlockSpec((1, c_out), full2)]
        args += [params["wr"], params["br"]]

    flops = 2 * B * L * (3 * c_in * c_out + 3 * c_out * c_out
                         + (c_in * c_out if has_proj else 0))
    bytes_accessed = (int(x.size) * x.dtype.itemsize
                      + B * L * c_out * out_dtype.itemsize
                      + sum(int(a.size) * a.dtype.itemsize for a in args[1:]))

    return pl.pallas_call(
        _make_basic_block_kernel(Bb, L, c_in, c_out, has_proj, out_dtype),
        out_shape=jax.ShapeDtypeStruct((B, L, c_out), out_dtype),
        grid=(B // Bb,),
        in_specs=in_specs,
        out_specs=pl.BlockSpec((Bb, L, c_out), lambda b: (b, 0, 0)),
        compiler_params=pltpu.CompilerParams(dimension_semantics=("parallel",)),
        cost_estimate=pl.CostEstimate(flops=flops, transcendentals=0,
                                      bytes_accessed=bytes_accessed),
    )(*args)


def basic_block_forward(params, x, *, out_dtype=F32, block_batch=None):
    """PyTorch-layout adapter: x (B, C_in, L) -> (B, C_out, L).
    In a full channels-last network call basic_block_forward_channels_last
    directly so the two transposes below disappear entirely."""
    y = basic_block_forward_channels_last(
        params, jnp.transpose(x, (0, 2, 1)), out_dtype=out_dtype,
        block_batch=block_batch)
    return jnp.transpose(y, (0, 2, 1))


# ----------------------------------------------------------------------------
# Parameter preparation: fold BN into conv, repack to MXU-friendly layout
# ----------------------------------------------------------------------------
def fold_bn_into_conv(w, b, gamma, beta, mean, var, eps=1e-5):
    """torch Conv1d weight (Cout,Cin,K)+bias and BN running stats ->
    (K, Cin, Cout) bf16 weight and (1, Cout) f32 bias (BN folded in)."""
    scale = gamma / jnp.sqrt(var + eps)                              # (Cout,)
    w_f = jnp.transpose(w, (2, 1, 0)).astype(F32) * scale[None, None, :]
    b_f = (b - mean) * scale + beta
    return w_f.astype(BF16), b_f.reshape(1, -1).astype(F32)


def prepare_params(raw, eps=1e-5):
    p = {}
    p["w1"], p["b1"] = fold_bn_into_conv(raw["c1w"], raw["c1b"], *raw["bn1"], eps=eps)
    p["w2"], p["b2"] = fold_bn_into_conv(raw["c2w"], raw["c2b"], *raw["bn2"], eps=eps)
    if "rw" in raw:                                                  # 1x1 residual conv
        p["wr"] = jnp.transpose(raw["rw"][:, :, 0], (1, 0)).astype(BF16)  # (Cin,Cout)
        p["br"] = raw["rb"].reshape(1, -1).astype(F32)
    return p


# ----------------------------------------------------------------------------
# Pure-JAX f32 reference of the PyTorch module (validation only)
# ----------------------------------------------------------------------------
def _conv1d_ref(x, w, b, padding):
    y = lax.conv_general_dilated(
        x.astype(F32), w.astype(F32), window_strides=(1,),
        padding=[(padding, padding)], dimension_numbers=("NCH", "OIH", "NCH"))
    return y + b[None, :, None]


def _bn_ref(x, gamma, beta, mean, var, eps=1e-5):
    inv = gamma / jnp.sqrt(var + eps)
    return (x - mean[None, :, None]) * inv[None, :, None] + beta[None, :, None]


def basic_block_ref(raw, x):
    h = jax.nn.relu(_bn_ref(_conv1d_ref(x, raw["c1w"], raw["c1b"], 1), *raw["bn1"]))
    h = jax.nn.relu(_bn_ref(_conv1d_ref(h, raw["c2w"], raw["c2b"], 1), *raw["bn2"]))
    res = _conv1d_ref(x, raw["rw"], raw["rb"], 0) if "rw" in raw else x
    return h + res


# ----------------------------------------------------------------------------
# Deterministic init (shapes from the PyTorch __init__)
# ----------------------------------------------------------------------------
def init_raw_params(key, c_in, c_out):
    ks = jax.random.split(key, 12)

    def w(k, shape, fan_in):
        return (jax.random.normal(k, shape) / jnp.sqrt(fan_in)).astype(F32)

    def bn(k1, k2, k3, n):
        return (1.0 + 0.1 * jax.random.normal(k1, (n,)),                    # gamma
                0.1 * jax.random.normal(k2, (n,)),                          # beta
                0.1 * jax.random.normal(k3, (n,)),                          # running_mean
                0.5 + jax.random.uniform(jax.random.fold_in(k3, 1), (n,)))  # running_var

    raw = {
        "c1w": w(ks[0], (c_out, c_in, 3), 3 * c_in),
        "c1b": 0.1 * jax.random.normal(ks[1], (c_out,)),
        "bn1": bn(ks[2], ks[3], ks[4], c_out),
        "c2w": w(ks[5], (c_out, c_out, 3), 3 * c_out),
        "c2b": 0.1 * jax.random.normal(ks[6], (c_out,)),
        "bn2": bn(ks[7], ks[8], ks[9], c_out),
    }
    if c_in != c_out:
        raw["rw"] = w(ks[10], (c_out, c_in, 1), c_in)
        raw["rb"] = 0.1 * jax.random.normal(ks[11], (c_out,))
    return raw


# ----------------------------------------------------------------------------
if __name__ == "__main__":
    key = jax.random.PRNGKey(0)
    kp, kx, kp2, kx2 = jax.random.split(key, 4)

    # Config 1: C_in != C_out exercises the 1x1-conv residual projection;
    # C_out = 128 keeps output stores lane-dense.
    B, C_in, C_out, L = 2, 64, 128, 32
    raw = init_raw_params(kp, C_in, C_out)
    params = prepare_params(raw)
    x = jax.random.normal(kx, (B, C_in, L), dtype=F32)
    ref = basic_block_ref(raw, x)

    # PyTorch-layout adapter (f32 output).
    out = jax.block_until_ready(jax.jit(basic_block_forward)(params, x))
    assert out.shape == (B, C_out, L), out.shape
    assert bool(jnp.all(jnp.isfinite(out)))
    assert bool(jnp.allclose(out, ref, atol=1e-1, rtol=1e-1)), \
        float(jnp.max(jnp.abs(out - ref)))

    # Channels-last fast path (bf16 output) -- the layout the kernel is tuned for.
    x_cl = jnp.transpose(x, (0, 2, 1))
    out_cl = jax.block_until_ready(
        jax.jit(basic_block_forward_channels_last)(params, x_cl))
    assert out_cl.shape == (B, L, C_out) and out_cl.dtype == BF16
    assert bool(jnp.allclose(jnp.transpose(out_cl, (0, 2, 1)).astype(F32), ref,
                             atol=1e-1, rtol=1e-1))

    # Config 2: identity residual (in_channels == out_channels -> res_layer=None).
    raw2 = init_raw_params(kp2, 128, 128)
    params2 = prepare_params(raw2)
    x2 = jax.random.normal(kx2, (2, 128, 16), dtype=F32)
    out2 = jax.block_until_ready(jax.jit(basic_block_forward)(params2, x2))
    ref2 = basic_block_ref(raw2, x2)
    assert out2.shape == (2, 128, 16)
    assert bool(jnp.allclose(out2, ref2, atol=1e-1, rtol=1e-1)), \
        float(jnp.max(jnp.abs(out2 - ref2)))

    # TODO(synk): BatchNorm1d is folded with eval-mode running stats only;
    # training-mode batch statistics are not implemented in the kernel.
    print("KERNEL_OK")
</pallas_src>

<mosaic_0001>
module attributes {stable_mosaic.version = 11 : i64} {
  func.func @kernel(%arg0: i32, %arg1: memref<2x32x64xf32, #tpu.memory_space<vmem>>, %arg2: memref<3x64x128xbf16, #tpu.memory_space<vmem>>, %arg3: memref<1x128xf32, #tpu.memory_space<vmem>>, %arg4: memref<3x128x128xbf16, #tpu.memory_space<vmem>>, %arg5: memref<1x128xf32, #tpu.memory_space<vmem>>, %arg6: memref<64x128xbf16, #tpu.memory_space<vmem>>, %arg7: memref<1x128xf32, #tpu.memory_space<vmem>>, %arg8: memref<2x32x128xf32, #tpu.memory_space<vmem>>) attributes {dimension_semantics = [#tpu.dimension_semantics<parallel>], iteration_bounds = array<i64: 1>, scalar_prefetch = 0 : i64, scratch_operands = 0 : i64, tpu.core_type = #tpu.core_type<tc>, window_params = [{transform_indices = @transform_0, window_bounds = array<i64: 2, 32, 64>}, {pipeline_mode = #tpu.pipeline_mode<synchronous>, transform_indices = @transform_1, window_bounds = array<i64: 3, 64, 128>}, {pipeline_mode = #tpu.pipeline_mode<synchronous>, transform_indices = @transform_2, window_bounds = array<i64: 1, 128>}, {pipeline_mode = #tpu.pipeline_mode<synchronous>, transform_indices = @transform_3, window_bounds = array<i64: 3, 128, 128>}, {pipeline_mode = #tpu.pipeline_mode<synchronous>, transform_indices = @transform_4, window_bounds = array<i64: 1, 128>}, {pipeline_mode = #tpu.pipeline_mode<synchronous>, transform_indices = @transform_5, window_bounds = array<i64: 64, 128>}, {pipeline_mode = #tpu.pipeline_mode<synchronous>, transform_indices = @transform_6, window_bounds = array<i64: 1, 128>}, {transform_indices = @transform_7, window_bounds = array<i64: 2, 32, 128>}]} {
    %c0 = arith.constant 0 : index
    %c0_0 = arith.constant 0 : index
    %c0_1 = arith.constant 0 : index
    %0 = vector.load %arg1[%c0, %c0_0, %c0_1] : memref<2x32x64xf32, #tpu.memory_space<vmem>>, vector<2x32x64xf32>
    %1 = vector.shape_cast %0 : vector<2x32x64xf32> to vector<64x64xf32>
    %2 = arith.truncf %1 : vector<64x64xf32> to vector<64x64xbf16>
    %c0_2 = arith.constant 0 : index
    %c0_3 = arith.constant 0 : index
    %c0_4 = arith.constant 0 : index
    %3 = vector.load %arg2[%c0_2, %c0_3, %c0_4] : memref<3x64x128xbf16, #tpu.memory_space<vmem>>, vector<1x64x128xbf16>
    %4 = vector.shape_cast %3 : vector<1x64x128xbf16> to vector<64x128xbf16>
    %cst = arith.constant dense<0.000000e+00> : vector<64x128xf32>
    %5 = tpu.matmul %2, %4, %cst {dimension_numbers = #tpu.dot_dimension_numbers<[1], [0], [0], [1], [0, 0, 1, 1], [], []>} : vector<64x64xbf16>, vector<64x128xbf16>, vector<64x128xf32> -> vector<64x128xf32>
    %c1 = arith.constant 1 : index
    %c0_5 = arith.constant 0 : index
    %c0_6 = arith.constant 0 : index
    %6 = vector.load %arg2[%c1, %c0_5, %c0_6] : memref<3x64x128xbf16, #tpu.memory_space<vmem>>, vector<1x64x128xbf16>
    %7 = vector.shape_cast %6 : vector<1x64x128xbf16> to vector<64x128xbf16>
    %cst_7 = arith.constant dense<0.000000e+00> : vector<64x128xf32>
    %8 = tpu.matmul %2, %7, %cst_7 {dimension_numbers = #tpu.dot_dimension_numbers<[1], [0], [0], [1], [0, 0, 1, 1], [], []>} : vector<64x64xbf16>, vector<64x128xbf16>, vector<64x128xf32> -> vector<64x128xf32>
    %c2 = arith.constant 2 : index
    %c0_8 = arith.constant 0 : index
    %c0_9 = arith.constant 0 : index
    %9 = vector.load %arg2[%c2, %c0_8, %c0_9] : memref<3x64x128xbf16, #tpu.memory_space<vmem>>, vector<1x64x128xbf16>
    %10 = vector.shape_cast %9 : vector<1x64x128xbf16> to vector<64x128xbf16>
    %cst_10 = arith.constant dense<0.000000e+00> : vector<64x128xf32>
    %11 = tpu.matmul %2, %10, %cst_10 {dimension_numbers = #tpu.dot_dimension_numbers<[1], [0], [0], [1], [0, 0, 1, 1], [], []>} : vector<64x64xbf16>, vector<64x128xbf16>, vector<64x128xf32> -> vector<64x128xf32>
    %12 = tpu.iota {dimensions = array<i32: 0>} : vector<64x1xi32>
    %c32_i32 = arith.constant 32 : i32
    %c0_i32 = arith.constant 0 : i32
    %13 = arith.cmpi eq, %c32_i32, %c0_i32 : i32
    %c1_i32 = arith.constant 1 : i32
    %14 = arith.select %13, %c1_i32, %c32_i32 : i32
    %15 = vector.broadcast %14 : i32 to vector<64x1xi32>
    %16 = arith.remsi %12, %15 : vector<64x1xi32>
    %c0_i32_11 = arith.constant 0 : i32
    %17 = vector.broadcast %c0_i32_11 : i32 to vector<64x1xi32>
    %18 = arith.cmpi ne, %16, %17 : vector<64x1xi32>
    %c0_i32_12 = arith.constant 0 : i32
    %19 = vector.broadcast %c0_i32_12 : i32 to vector<64x1xi32>
    %20 = arith.cmpi slt, %16, %19 : vector<64x1xi32>
    %c0_i32_13 = arith.constant 0 : i32
    %21 = arith.cmpi slt, %14, %c0_i32_13 : i32
    %22 = vector.broadcast %21 : i1 to vector<64x1xi1>
    %23 = vector.broadcast %22 : vector<64x1xi1> to vector<64x1xi1>
    %24 = arith.xori %20, %23 : vector<64x1xi1>
    %25 = arith.andi %24, %18 : vector<64x1xi1>
    %26 = vector.broadcast %14 : i32 to vector<64x1xi32>
    %27 = arith.addi %16, %26 : vector<64x1xi32>
    %28 = arith.select %25, %27, %16 : vector<64x1xi1>, vector<64x1xi32>
    %c0_i32_14 = arith.constant 0 : i32
    %29 = vector.broadcast %c0_i32_14 : i32 to vector<64x1xi32>
    %30 = arith.cmpi eq, %28, %29 : vector<64x1xi32>
    %c1_i32_15 = arith.constant 1 : i32
    %31 = tpu.dynamic_rotate %5 by %c1_i32_15 dim 0 : vector<64x128xf32>, i32 -> vector<64x128xf32>
    %cst_16 = arith.constant 0.000000e+00 : f32
    %32 = vector.shape_cast %30 : vector<64x1xi1> to vector<64x1xi1>
    %33 = vector.broadcast %32 : vector<64x1xi1> to vector<64x128xi1>
    %34 = vector.broadcast %cst_16 : f32 to vector<64x128xf32>
    %35 = arith.select %33, %34, %31 : vector<64x128xi1>, vector<64x128xf32>
    %c31_i32 = arith.constant 31 : i32
    %36 = vector.broadcast %c31_i32 : i32 to vector<64x1xi32>
    %37 = arith.cmpi eq, %28, %36 : vector<64x1xi32>
    %c63_i32 = arith.constant 63 : i32
    %38 = tpu.dynamic_rotate %11 by %c63_i32 dim 0 : vector<64x128xf32>, i32 -> vector<64x128xf32>
    %cst_17 = arith.constant 0.000000e+00 : f32
    %39 = vector.shape_cast %37 : vector<64x1xi1> to vector<64x1xi1>
    %40 = vector.broadcast %39 : vector<64x1xi1> to vector<64x128xi1>
    %41 = vector.broadcast %cst_17 : f32 to vector<64x128xf32>
    %42 = arith.select %40, %41, %38 : vector<64x128xi1>, vector<64x128xf32>
    %43 = arith.addf %35, %8 : vector<64x128xf32>
    %44 = arith.addf %43, %42 : vector<64x128xf32>
    %c0_18 = arith.constant 0 : index
    %c0_19 = arith.constant 0 : index
    %45 = vector.load %arg3[%c0_18, %c0_19] : memref<1x128xf32, #tpu.memory_space<vmem>>, vector<1x128xf32>
    %46 = vector.broadcast %45 : vector<1x128xf32> to vector<64x128xf32>
    %47 = arith.addf %44, %46 : vector<64x128xf32>
    %cst_20 = arith.constant 0.000000e+00 : f32
    %48 = vector.broadcast %cst_20 : f32 to vector<64x128xf32>
    %49 = arith.maximumf %47, %48 : vector<64x128xf32>
    %50 = arith.truncf %49 : vector<64x128xf32> to vector<64x128xbf16>
    %c0_21 = arith.constant 0 : index
    %c0_22 = arith.constant 0 : index
    %c0_23 = arith.constant 0 : index
    %51 = vector.load %arg4[%c0_21, %c0_22, %c0_23] : memref<3x128x128xbf16, #tpu.memory_space<vmem>>, vector<1x128x128xbf16>
    %52 = vector.shape_cast %51 : vector<1x128x128xbf16> to vector<128x128xbf16>
    %cst_24 = arith.constant dense<0.000000e+00> : vector<64x128xf32>
    %53 = tpu.matmul %50, %52, %cst_24 {dimension_numbers = #tpu.dot_dimension_numbers<[1], [0], [0], [1], [0, 0, 1, 1], [], []>} : vector<64x128xbf16>, vector<128x128xbf16>, vector<64x128xf32> -> vector<64x128xf32>
    %c1_25 = arith.constant 1 : index
    %c0_26 = arith.constant 0 : index
    %c0_27 = arith.constant 0 : index
    %54 = vector.load %arg4[%c1_25, %c0_26, %c0_27] : memref<3x128x128xbf16, #tpu.memory_space<vmem>>, vector<1x128x128xbf16>
    %55 = vector.shape_cast %54 : vector<1x128x128xbf16> to vector<128x128xbf16>
    %cst_28 = arith.constant dense<0.000000e+00> : vector<64x128xf32>
    %56 = tpu.matmul %50, %55, %cst_28 {dimension_numbers = #tpu.dot_dimension_numbers<[1], [0], [0], [1], [0, 0, 1, 1], [], []>} : vector<64x128xbf16>, vector<128x128xbf16>, vector<64x128xf32> -> vector<64x128xf32>
    %c2_29 = arith.constant 2 : index
    %c0_30 = arith.constant 0 : index
    %c0_31 = arith.constant 0 : index
    %57 = vector.load %arg4[%c2_29, %c0_30, %c0_31] : memref<3x128x128xbf16, #tpu.memory_space<vmem>>, vector<1x128x128xbf16>
    %58 = vector.shape_cast %57 : vector<1x128x128xbf16> to vector<128x128xbf16>
    %cst_32 = arith.constant dense<0.000000e+00> : vector<64x128xf32>
    %59 = tpu.matmul %50, %58, %cst_32 {dimension_numbers = #tpu.dot_dimension_numbers<[1], [0], [0], [1], [0, 0, 1, 1], [], []>} : vector<64x128xbf16>, vector<128x128xbf16>, vector<64x128xf32> -> vector<64x128xf32>
    %60 = tpu.iota {dimensions = array<i32: 0>} : vector<64x1xi32>
    %c32_i32_33 = arith.constant 32 : i32
    %c0_i32_34 = arith.constant 0 : i32
    %61 = arith.cmpi eq, %c32_i32_33, %c0_i32_34 : i32
    %c1_i32_35 = arith.constant 1 : i32
    %62 = arith.select %61, %c1_i32_35, %c32_i32_33 : i32
    %63 = vector.broadcast %62 : i32 to vector<64x1xi32>
    %64 = arith.remsi %60, %63 : vector<64x1xi32>
    %c0_i32_36 = arith.constant 0 : i32
    %65 = vector.broadcast %c0_i32_36 : i32 to vector<64x1xi32>
    %66 = arith.cmpi ne, %64, %65 : vector<64x1xi32>
    %c0_i32_37 = arith.constant 0 : i32
    %67 = vector.broadcast %c0_i32_37 : i32 to vector<64x1xi32>
    %68 = arith.cmpi slt, %64, %67 : vector<64x1xi32>
    %c0_i32_38 = arith.constant 0 : i32
    %69 = arith.cmpi slt, %62, %c0_i32_38 : i32
    %70 = vector.broadcast %69 : i1 to vector<64x1xi1>
    %71 = vector.broadcast %70 : vector<64x1xi1> to vector<64x1xi1>
    %72 = arith.xori %68, %71 : vector<64x1xi1>
    %73 = arith.andi %72, %66 : vector<64x1xi1>
    %74 = vector.broadcast %62 : i32 to vector<64x1xi32>
    %75 = arith.addi %64, %74 : vector<64x1xi32>
    %76 = arith.select %73, %75, %64 : vector<64x1xi1>, vector<64x1xi32>
    %c0_i32_39 = arith.constant 0 : i32
    %77 = vector.broadcast %c0_i32_39 : i32 to vector<64x1xi32>
    %78 = arith.cmpi eq, %76, %77 : vector<64x1xi32>
    %c1_i32_40 = arith.constant 1 : i32
    %79 = tpu.dynamic_rotate %53 by %c1_i32_40 dim 0 : vector<64x128xf32>, i32 -> vector<64x128xf32>
    %cst_41 = arith.constant 0.000000e+00 : f32
    %80 = vector.shape_cast %78 : vector<64x1xi1> to vector<64x1xi1>
    %81 = vector.broadcast %80 : vector<64x1xi1> to vector<64x128xi1>
    %82 = vector.broadcast %cst_41 : f32 to vector<64x128xf32>
    %83 = arith.select %81, %82, %79 : vector<64x128xi1>, vector<64x128xf32>
    %c31_i32_42 = arith.constant 31 : i32
    %84 = vector.broadcast %c31_i32_42 : i32 to vector<64x1xi32>
    %85 = arith.cmpi eq, %76, %84 : vector<64x1xi32>
    %c63_i32_43 = arith.constant 63 : i32
    %86 = tpu.dynamic_rotate %59 by %c63_i32_43 dim 0 : vector<64x128xf32>, i32 -> vector<64x128xf32>
    %cst_44 = arith.constant 0.000000e+00 : f32
    %87 = vector.shape_cast %85 : vector<64x1xi1> to vector<64x1xi1>
    %88 = vector.broadcast %87 : vector<64x1xi1> to vector<64x128xi1>
    %89 = vector.broadcast %cst_44 : f32 to vector<64x128xf32>
    %90 = arith.select %88, %89, %86 : vector<64x128xi1>, vector<64x128xf32>
    %91 = arith.addf %83, %56 : vector<64x128xf32>
    %92 = arith.addf %91, %90 : vector<64x128xf32>
    %c0_45 = arith.constant 0 : index
    %c0_46 = arith.constant 0 : index
    %93 = vector.load %arg5[%c0_45, %c0_46] : memref<1x128xf32, #tpu.memory_space<vmem>>, vector<1x128xf32>
    %94 = vector.broadcast %93 : vector<1x128xf32> to vector<64x128xf32>
    %95 = arith.addf %92, %94 : vector<64x128xf32>
    %cst_47 = arith.constant 0.000000e+00 : f32
    %96 = vector.broadcast %cst_47 : f32 to vector<64x128xf32>
    %97 = arith.maximumf %95, %96 : vector<64x128xf32>
    %c0_48 = arith.constant 0 : index
    %c0_49 = arith.constant 0 : index
    %98 = vector.load %arg6[%c0_48, %c0_49] : memref<64x128xbf16, #tpu.memory_space<vmem>>, vector<64x128xbf16>
    %cst_50 = arith.constant dense<0.000000e+00> : vector<64x128xf32>
    %99 = tpu.matmul %2, %98, %cst_50 {dimension_numbers = #tpu.dot_dimension_numbers<[1], [0], [0], [1], [0, 0, 1, 1], [], []>} : vector<64x64xbf16>, vector<64x128xbf16>, vector<64x128xf32> -> vector<64x128xf32>
    %c0_51 = arith.constant 0 : index
    %c0_52 = arith.constant 0 : index
    %100 = vector.load %arg7[%c0_51, %c0_52] : memref<1x128xf32, #tpu.memory_space<vmem>>, vector<1x128xf32>
    %101 = vector.broadcast %100 : vector<1x128xf32> to vector<64x128xf32>
    %102 = arith.addf %99, %101 : vector<64x128xf32>
    %103 = arith.addf %97, %102 : vector<64x128xf32>
    %104 = vector.shape_cast %103 : vector<64x128xf32> to vector<2x32x128xf32>
    %c0_53 = arith.constant 0 : index
    %c0_54 = arith.constant 0 : index
    %c0_55 = arith.constant 0 : index
    %105 = vector.load %arg8[%c0_53, %c0_54, %c0_55] : memref<2x32x128xf32, #tpu.memory_space<vmem>>, vector<2x32x128xf32>
    tpu.vector_store %arg8[%c0_53, %c0_54, %c0_55], %104 {strides = array<i32>} : memref<2x32x128xf32, #tpu.memory_space<vmem>>, vector<2x32x128xf32>,
    return
  }
  func.func @transform_0(%arg0: i32) -> (i32, i32, i32) {
    %c0_i32 = arith.constant 0 : i32
    %c0_i32_0 = arith.constant 0 : i32
    %c0_i32_1 = arith.constant 0 : i32
    return %arg0, %c0_i32, %c0_i32_0 : i32, i32, i32
  }
  func.func @transform_1(%arg0: i32) -> (i32, i32, i32) {
    %c0_i32 = arith.constant 0 : i32
    %c0_i32_0 = arith.constant 0 : i32
    %c0_i32_1 = arith.constant 0 : i32
    %c0_i32_2 = arith.constant 0 : i32
    return %c0_i32, %c0_i32_0, %c0_i32_1 : i32, i32, i32
  }
  func.func @transform_2(%arg0: i32) -> (i32, i32) {
    %c0_i32 = arith.constant 0 : i32
    %c0_i32_0 = arith.constant 0 : i32
    %c0_i32_1 = arith.constant 0 : i32
    return %c0_i32, %c0_i32_0 : i32, i32
  }
  func.func @transform_3(%arg0: i32) -> (i32, i32, i32) {
    %c0_i32 = arith.constant 0 : i32
    %c0_i32_0 = arith.constant 0 : i32
    %c0_i32_1 = arith.constant 0 : i32
    %c0_i32_2 = arith.constant 0 : i32
    return %c0_i32, %c0_i32_0, %c0_i32_1 : i32, i32, i32
  }
  func.func @transform_4(%arg0: i32) -> (i32, i32) {
    %c0_i32 = arith.constant 0 : i32
    %c0_i32_0 = arith.constant 0 : i32
    %c0_i32_1 = arith.constant 0 : i32
    return %c0_i32, %c0_i32_0 : i32, i32
  }
  func.func @transform_5(%arg0: i32) -> (i32, i32) {
    %c0_i32 = arith.constant 0 : i32
    %c0_i32_0 = arith.constant 0 : i32
    %c0_i32_1 = arith.constant 0 : i32
    return %c0_i32, %c0_i32_0 : i32, i32
  }
  func.func @transform_6(%arg0: i32) -> (i32, i32) {
    %c0_i32 = arith.constant 0 : i32
    %c0_i32_0 = arith.constant 0 : i32
    %c0_i32_1 = arith.constant 0 : i32
    return %c0_i32, %c0_i32_0 : i32, i32
  }
  func.func @transform_7(%arg0: i32) -> (i32, i32, i32) {
    %c0_i32 = arith.constant 0 : i32
    %c0_i32_0 = arith.constant 0 : i32
    %c0_i32_1 = arith.constant 0 : i32
    return %arg0, %c0_i32, %c0_i32_0 : i32, i32, i32
  }
}

</mosaic_0001>

<bundles_post_ra>
// kernel: basic_block_forward.1
= control target key start
LH: loop header
LB: loop body
LE: loop exit
PB: predicated region body
PF: predicated region fallthrough
CT: control target
= control target key end

     0   :  { %12 = vsyncpa [#allocation3], 0  ;;  %s1948_s0 = inlined_call_operand.hbm [shape: f32[2,32,64], index: 0, kind: input, shape index: {}]   ;;  %s1949_s1 = inlined_call_operand.hbm [shape: bf16[3,64,128], index: 1, kind: input, shape index: {}]   ;;  %s1950_s2 = inlined_call_operand.vmem [shape: f32[1,128], index: 2, kind: input, shape index: {}]   ;;  %s1951_s3 = inlined_call_operand.hbm [shape: bf16[3,128,128], index: 3, kind: input, shape index: {}]   ;;  %s1952_s4 = inlined_call_operand.vmem [shape: f32[1,128], index: 4, kind: input, shape index: {}]   ;;  %s1953_s5 = inlined_call_operand.hbm [shape: bf16[64,128], index: 5, kind: input, shape index: {}]   ;;  %s1954_s6 = inlined_call_operand.vmem [shape: f32[1,128], index: 6, kind: input, shape index: {}]   ;;  %s1955_s7 = inlined_call_operand.hbm [shape: f32[2,32,128], index: 7, kind: output, shape index: {}]  }
   0x1   :  { %13 = vsyncpa [#allocation6], 0 }
   0x2   :  { %14 = vsyncpa [#allocation9], 0 }
   0x3   :  { %15 = vsyncpa [#allocation4], 0  ;;  %s1682_s24 = smov [#allocation5]  }
   0x4   :  { %s33_s25 = sshll.u32 %s1682_s24, 4  ;;  %s34_s25 = int_to_ptr.vmem [resolvable:$true] %s33_s25 }
   0x5   :  { %s1582_s26 = scalar_lea.vmem %s34_s25, 1536  ;;  %p1587_p1 = scmp.lt.s32.totalorder %s34_s25, %s34_s25 }
   0x6   :  { %p1583_p0 = scmp.ne.s32.totalorder %s34_s25, %s1582_s26  ;;  %p1588_p2 = scmp.lt.s32.totalorder %s1582_s26, %s1582_s26 }
   0x8   :  { %p1589_p3 = por %p1588_p2, %p1587_p1 }
   0xa   :  { %p1590_p4 = pnand %p1589_p3, %p1583_p0 }
   0xc   :  { %1593 = shalt.err (!%p1590_p4)
}
   0xd   :  { %s1683_s27 = smov 64   ;;  %s1684_s28 = smov 4  }
   0xe   :  { %39 = dma.hbm_to_vmem [thread:$0]  %s1949_s1, 1536, %s34_s25, [#allocation6], %s1683_s27, %s1683_s27, %s1684_s28  }
   0xf   :  { %s1685_s8 = smov [#allocation2]  }
  0x10   :  { %s21_s9 = sshll.u32 %s1685_s8, 4  ;;  %s22_s9 = int_to_ptr.vmem [resolvable:$true] %s21_s9 }
  0x11   :  { %s1602_s10 = scalar_lea.vmem %s22_s9, 1024  ;;  %p1607_p6 = scmp.lt.s32.totalorder %s22_s9, %s22_s9 }
  0x12   :  { %p1603_p5 = scmp.ne.s32.totalorder %s22_s9, %s1602_s10  ;;  %p1608_p7 = scmp.lt.s32.totalorder %s1602_s10, %s1602_s10 }
  0x14   :  { %p1609_p8 = por %p1608_p7, %p1607_p6 }
  0x16   :  { %p1610_p9 = pnand %p1609_p8, %p1603_p5 }
  0x18   :  { %1613 = shalt.err (!%p1610_p9)
}
  0x19   :  { %s1686_s11 = smov 128   ;;  %s1687_s12 = smov 8  }
  0x1a   :  { %27 = dma.hbm_to_vmem [thread:$0]  %s1948_s0, 1024, %s22_s9, [#allocation3], %s1686_s11, %s1686_s11, %s1687_s12  }
  0x1b   :  { %s1688_s1 = smov [#allocation7]   ;;  %s1689_s16 = smov [#allocation8]  }
  0x1c   :  { %s47_s15 = sshll.u32 %s1688_s1, 4  ;;  %s61_s17 = sshll.u32 %s1689_s16, 4  ;;  %s48_s15 = int_to_ptr.vmem [resolvable:$true] %s47_s15  ;;  %s62_s17 = int_to_ptr.vmem [resolvable:$true] %s61_s17 }
  0x1d   :  { %s1622_s18 = scalar_lea.vmem %s48_s15, 3072  ;;  %p1627_p11 = scmp.lt.s32.totalorder %s48_s15, %s48_s15 }
  0x1e   :  { %p1623_p10 = scmp.ne.s32.totalorder %s48_s15, %s1622_s18  ;;  %p1628_p12 = scmp.lt.s32.totalorder %s1622_s18, %s1622_s18 }
  0x20   :  { %p1629_p13 = por %p1628_p12, %p1627_p11 }
  0x22   :  { %p1630_p0 = pnand %p1629_p13, %p1623_p10 }
  0x24   :  { %1633 = shalt.err (!%p1630_p0)
}
  0x25   :  { %53 = dma.hbm_to_vmem [thread:$0]  %s1951_s3, 3072, %s48_s15, [#allocation6], %s1683_s27, %s1683_s27, %s1684_s28  }
  0x26   :  { %s1642_s0 = scalar_lea.vmem %s62_s17, 512  ;;  %p1647_p2 = scmp.lt.s32.totalorder %s62_s17, %s62_s17 }
  0x27   :  { %p1643_p1 = scmp.ne.s32.totalorder %s62_s17, %s1642_s0  ;;  %p1648_p3 = scmp.lt.s32.totalorder %s1642_s0, %s1642_s0 }
  0x29   :  { %p1649_p4 = por %p1648_p3, %p1647_p2 }
  0x2b   :  { %p1650_p5 = pnand %p1649_p4, %p1643_p1 }
  0x2d   :  { %1653 = shalt.err (!%p1650_p5)
}
  0x2e   :  { %67 = dma.hbm_to_vmem [thread:$0]  %s1953_s5, 512, %s62_s17, [#allocation9], %s1683_s27, %s1683_s27, %s1684_s28  }
  0x2f   :  { %1674 = dma.done.wait [#allocation3], 1024  }
  0x30   :  { %1675 = vsyncadd [#allocation3], 4294966272 }
  0x31   :  { %1676 = dma.done.wait [#allocation6], 4608  }
  0x32   :  { %1677 = vsyncadd [#allocation6], 4294962688 }
  0x33   :  { %1678 = dma.done.wait [#allocation9], 512  }
  0x34   :  { %1679 = vsyncadd [#allocation9], 4294966784  ;;  %v1534_v0 = vld [vmem:[#allocation5 + $0x18] sm:$0xff]   ;;  %v1536_v2 = vld [vmem:[#allocation5 + $0x10] sm:$0xff]   ;;  %vm127_vm0 = vcmask 523264   ;;  %v401_v47 = vlaneseq }
  0x35   :  { %v1535_v1 = vld [vmem:[#allocation5 + $0x38] sm:$0xff]   ;;  %1389 = vmatprep.subr.bf16.mxu0 %v1534_v0  ;;  %v1537_v3 = vld [vmem:[#allocation5 + $0x30] sm:$0xff]   ;;  %v1538_v4 = vld [vmem:[#allocation5 + $0x8] sm:$0xff]  }
  0x36   :  { %1390 = vmatpush3.bf16.msra.mxu0 %v1534_v0  ;;  %1405 = vmatprep.subr.bf16.mxu1 %v1535_v1  ;;  %v1539_v5 = vld [vmem:[#allocation5 + $0x28] sm:$0xff]   ;;  %v83_v6 = vld [vmem:[#allocation2] sm:$0xff]  ;;  %v85_v11 = vld [vmem:[#allocation2 + $0x10] sm:$0xff]  ;;  %v1793_v50 = vshrl.u32 %v401_v47, 7 }
  0x37   :  { %1391 = vmatprep.subr.bf16.mxu0 %v1536_v2  ;;  %1406 = vmatpush3.bf16.msra.mxu1 %v1535_v1  ;;  %v84_v7 = vld [vmem:[#allocation2 + $0x8] sm:$0xff]  ;;  %v1540_v8 = vld [vmem:[#allocation5] sm:$0xff]   ;;  %v86_v12 = vld [vmem:[#allocation2 + $0x18] sm:$0xff] }
  0x38   :  { %1407 = vmatprep.subr.bf16.mxu1 %v1537_v3  ;;  %v1755_v9 = vpack.c.bf16 %v84_v7, %v83_v6  ;;  %v1541_v10 = vld [vmem:[#allocation5 + $0x20] sm:$0xff]   ;;  %v1542_v13 = vld [vmem:[#allocation5 + $0x58] sm:$0xff]   ;;  %v88_v15 = vld [vmem:[#allocation2 + $0x28] sm:$0xff]  ;;  %v1761_v16 = vpack.c.bf16 %v86_v12, %v85_v11  ;;  %v406_v53 = vadd.s32 32, %v1793_v50  ;;  %v414_v56 = vand.u32 31, %v1793_v50 }
  0x39   :  { %v87_v14 = vld [vmem:[#allocation2 + $0x20] sm:$0xff]  ;;  %v1543_v17 = vld [vmem:[#allocation5 + $0x50] sm:$0xff]   ;;  %v90_v20 = vld [vmem:[#allocation2 + $0x38] sm:$0xff]  ;;  %v405_v63 = vadd.s32 24, %v1793_v50  ;;  %vm522_vm1 = vcmp.lt.s32.totalorder %v1793_v50, 1  ;;  %v409_v7 = vadd.s32 56, %v1793_v50 }
  0x3a   :  { %1392 = vmatpush3.bf16.msra.mxu0 %v1536_v2  ;;  %1397 = vmatprep.mubr.msk.bf16.mxu0 %vm127_vm0, %v1755_v9  ;;  %v1763_v18 = vpack.c.bf16 %v88_v15, %v87_v14  ;;  %v89_v19 = vld [vmem:[#allocation2 + $0x30] sm:$0xff]  ;;  %v1544_v21 = vld [vmem:[#allocation5 + $0x48] sm:$0xff]   ;;  %v1545_v23 = vld [vmem:[#allocation5 + $0x40] sm:$0xff]   ;;  %v442_v59 = vand.u32 31, %v406_v53  ;;  %vm1802_vm2 = vcmp.eq.s32.totalorder %v414_v56, 0  ;;  %vm571_vm4 = vcmp.lt.s32.totalorder %v1793_v50, 7 }
  0x3b   :  { %1393 = vmatprep.subr.bf16.mxu0 %v1538_v4  ;;  %1408 = vmatpush3.bf16.msra.mxu1 %v1537_v3  ;;  %v1773_v22 = vpack.c.bf16 %v90_v20, %v89_v19  ;;  %v1546_v24 = vld [vmem:[#allocation7 + $0x38] sm:$0xff]   ;;  %v1548_v26 = vld [vmem:[#allocation7 + $0x30] sm:$0xff]   ;;  %v1550_v28 = vld [vmem:[#allocation7 + $0x28] sm:$0xff]  }
  0x3c   :  { %1409 = vmatprep.subr.bf16.mxu1 %v1539_v5  ;;  %1413 = vmatprep.mubr.msk.bf16.mxu1 %vm127_vm0, %v1755_v9  ;;  %v1547_v25 = vld [vmem:[#allocation7 + $0x78] sm:$0xff]   ;;  %v1549_v27 = vld [vmem:[#allocation7 + $0x70] sm:$0xff]   ;;  %v1551_v29 = vld [vmem:[#allocation7 + $0x68] sm:$0xff]   ;;  %vm1809_vm3 = vcmp.eq.s32.totalorder %v442_v59, 0 }
  0x3d   :  { %v1552_v30 = vld [vmem:[#allocation7 + $0x20] sm:$0xff]   ;;  %v1554_v32 = vld [vmem:[#allocation7 + $0x18] sm:$0xff]   ;;  %v1556_v34 = vld [vmem:[#allocation7 + $0x10] sm:$0xff]  }
  0x3e   :  { %1394 = vmatpush3.bf16.msra.mxu0 %v1538_v4  ;;  %v1553_v31 = vld [vmem:[#allocation7 + $0x60] sm:$0xff]   ;;  %v1555_v33 = vld [vmem:[#allocation7 + $0x58] sm:$0xff]   ;;  %v1557_v35 = vld [vmem:[#allocation7 + $0x50] sm:$0xff]  }
  0x3f   :  { %1395 = vmatprep.subr.bf16.mxu0 %v1540_v8  ;;  %1410 = vmatpush3.bf16.msra.mxu1 %v1539_v5  ;;  %v1558_v36 = vld [vmem:[#allocation7 + $0x8] sm:$0xff]   ;;  %v1560_v38 = vld [vmem:[#allocation7] sm:$0xff]   ;;  %v1787_v40 = vld [vmem:[#allocation7 + $0xb8] sm:$0xff]  }
  0x40   :  { %1411 = vmatprep.subr.bf16.mxu1 %v1541_v10  ;;  %v1559_v37 = vld [vmem:[#allocation7 + $0x48] sm:$0xff]   ;;  %v1561_v39 = vld [vmem:[#allocation7 + $0x40] sm:$0xff]   ;;  %v1790_v41 = vld [vmem:[#allocation8 + $0x18] sm:$0xff]  }
  0x41   :  { %v1896_v2 = vld [vmem:[%s1952_s4] ss:$0 sm:$0xff]  ;;  %s1690_s4 = smov [#allocation10]  }
  0x42   :  { %1396 = vmatpush3.bf16.msra.mxu0 %v1540_v8 }
  0x43   :  { %1412 = vmatpush3.bf16.msra.mxu1 %v1541_v10  ;;  %1421 = vmatprep.subr.bf16.mxu0 %v1542_v13 }
  0x44   :  { %1437 = vmatprep.subr.bf16.mxu1 %v1546_v24 }
  0x45   :  { %1398 = vmatmul.mubr.msk.bf16.vlgmr.msra.gmra.mxu0 %vm127_vm0, %v1761_v16 }
  0x46   :  { %1422 = vmatpush3.bf16.msra.mxu0 %v1542_v13  ;;  %1414 = vmatmul.mubr.msk.bf16.vlgmr.msra.gmra.mxu1 %vm127_vm0, %v1761_v16  ;;  %v435_v13 = vand.u32 31, %v405_v63 }
  0x47   :  { %1423 = vmatprep.subr.bf16.mxu0 %v1543_v17  ;;  %1401 = vmatprep.mubr.msk.bf16.mxu0 %vm127_vm0, %v1763_v18 }
  0x48   :  { %1417 = vmatprep.mubr.msk.bf16.mxu1 %vm127_vm0, %v1763_v18  ;;  %1438 = vmatpush3.bf16.msra.mxu1 %v1546_v24  ;;  %vm1834_vm5 = vcmp.eq.s32.totalorder %v435_v13, 31 }
  0x49   :  { %1439 = vmatprep.subr.bf16.mxu1 %v1548_v26 }
  0x4a   :  { %1424 = vmatpush3.bf16.msra.mxu0 %v1543_v17 }
  0x4b   :  { %1425 = vmatprep.subr.bf16.mxu0 %v1544_v21 }
  0x4c   :  { %1440 = vmatpush3.bf16.msra.mxu1 %v1548_v26 }
  0x4d   :  { %1402 = vmatmul.mubr.msk.bf16.gmra.mxu0 %vm127_vm0, %v1773_v22  ;;  %1441 = vmatprep.subr.bf16.mxu1 %v1550_v28 }
  0x4e   :  { %1426 = vmatpush3.bf16.msra.mxu0 %v1544_v21  ;;  %1418 = vmatmul.mubr.msk.bf16.gmra.mxu1 %vm127_vm0, %v1773_v22 }
  0x4f   :  { %1427 = vmatprep.subr.bf16.mxu0 %v1545_v23  ;;  %1429 = vmatprep.mubr.msk.bf16.mxu0 %vm127_vm0, %v1755_v9 }
  0x50   :  { %1442 = vmatpush3.bf16.msra.mxu1 %v1550_v28 }
  0x51   :  { %1443 = vmatprep.subr.bf16.mxu1 %v1552_v30 }
  0x52   :  { %1428 = vmatpush3.bf16.msra.mxu0 %v1545_v23 }
  0x53   :  { %1461 = vmatprep.subr.bf16.mxu0 %v1547_v25 }
  0x54   :  { %1444 = vmatpush3.bf16.msra.mxu1 %v1552_v30 }
  0x55   :  { %1430 = vmatmul.mubr.msk.bf16.vlgmr.msra.gmra.mxu0 %vm127_vm0, %v1761_v16  ;;  %1445 = vmatprep.subr.bf16.mxu1 %v1554_v32 }
  0x56   :  { %1433 = vmatprep.mubr.msk.bf16.mxu0 %vm127_vm0, %v1763_v18  ;;  %1462 = vmatpush3.bf16.msra.mxu0 %v1547_v25  ;;  %v463_v25 = vand.u32 31, %v409_v7 }
  0x57   :  { %1463 = vmatprep.subr.bf16.mxu0 %v1549_v27 }
  0x58   :  { %1446 = vmatpush3.bf16.msra.mxu1 %v1554_v32  ;;  %vm1843_vm6 = vcmp.eq.s32.totalorder %v463_v25, 31 }
  0x59   :  { %1447 = vmatprep.subr.bf16.mxu1 %v1556_v34 }
  0x5a   :  { %1464 = vmatpush3.bf16.msra.mxu0 %v1549_v27 }
  0x5b   :  { %1465 = vmatprep.subr.bf16.mxu0 %v1551_v29 }
  0x5c   :  { %1448 = vmatpush3.bf16.msra.mxu1 %v1556_v34 }
  0x5d   :  { %1434 = vmatmul.mubr.msk.bf16.gmra.mxu0 %vm127_vm0, %v1773_v22  ;;  %1449 = vmatprep.subr.bf16.mxu1 %v1558_v36 }
  0x5e   :  { %1466 = vmatpush3.bf16.msra.mxu0 %v1551_v29 }
  0x5f   :  { %1467 = vmatprep.subr.bf16.mxu0 %v1553_v31 }
  0x60   :  { %1450 = vmatpush3.bf16.msra.mxu1 %v1558_v36 }
  0x61   :  { %1451 = vmatprep.subr.bf16.mxu1 %v1560_v38 }
  0x62   :  { %1468 = vmatpush3.bf16.msra.mxu0 %v1553_v31 }
  0x63   :  { %1469 = vmatprep.subr.bf16.mxu0 %v1555_v33 }
  0x64   :  { %1452 = vmatpush3.bf16.msra.mxu1 %v1560_v38 }
  0x65   :  { %1485 = vmatprep.subr.bf16.mxu1 %v1787_v40 }
  0x66   :  { %1470 = vmatpush3.bf16.msra.mxu0 %v1555_v33 }
  0x67   :  { %1471 = vmatprep.subr.bf16.mxu0 %v1557_v35 }
  0x6a   :  { %1472 = vmatpush3.bf16.msra.mxu0 %v1557_v35 }
  0x6b   :  { %1473 = vmatprep.subr.bf16.mxu0 %v1559_v37 }
  0x6e   :  { %1474 = vmatpush3.bf16.msra.mxu0 %v1559_v37 }
  0x6f   :  { %1475 = vmatprep.subr.bf16.mxu0 %v1561_v39 }
  0x72   :  { %1476 = vmatpush3.bf16.msra.mxu0 %v1561_v39 }
  0x73   :  { %1509 = vmatprep.subr.bf16.mxu0 %v1790_v41 }
 0x105   :  { %v1399_v42 = vpop.f32.mrf.mxu0 }
 0x106   :  { %v1415_v43 = vpop.f32.mrf.mxu1  ;;  %v516_v3 = vrot.slane %v1399_v42, 7 }
 0x107   :  { %v174_v44 = vpop.f32.mrf.mxu0 }
 0x108   :  { %v272_v46 = vpop.f32.mrf.mxu1  ;;  %v514_v60 = vrot.slane %v174_v44, 7 }
 0x109   :  { %v1400_v45 = vpop.f32.mrf.mxu0 }
 0x10a   :  { %v1416_v51 = vpop.f32.mrf.mxu1  ;;  %v517_v4 = vrot.slane %v1400_v45, 7 }
 0x10b   :  { %v177_v48 = vpop.f32.mrf.mxu0 }
 0x10c   :  { %v275_v55 = vpop.f32.mrf.mxu1  ;;  %v515_v61 = vrot.slane %v177_v48, 7  ;;  %v527_v21 = vsel %vm522_vm1, %v516_v3, %v517_v4 }
 0x10d   :  { %v1403_v49 = vpop.f32.mrf.mxu0  ;;  %v607_v47 = vadd.f32 %v1416_v51, %v527_v21 }
 0x10e   :  { %v1419_v1 = vpop.f32.mrf.mxu1  ;;  %v528_v10 = vsel %vm522_vm1, %v515_v61, %v516_v3  ;;  %v529_v11 = vsel %vm522_vm1, %v514_v60, %v515_v61  ;;  %v520_v26 = vrot.slane %v1403_v49, 7  ;;  %v1286_v49 = vld [vmem:[%s1950_s2] ss:$0 sm:$0xff] }
 0x10f   :  { %v1795_v52 = vpop.f32.mrf.mxu0  ;;  %v606_v30 = vadd.f32 %v1415_v43, %v528_v10  ;;  %v605_v31 = vadd.f32 %v529_v11, %v275_v55 }
 0x110   :  { %v518_v0 = vrot.slane %v1795_v52, 7  ;;  %v288_v15 = vpop.f32.mrf.mxu1 }
 0x111   :  { %v1404_v54 = vpop.f32.mrf.mxu0 }
 0x112   :  { %v521_v57 = vrot.slane %v1404_v54, 7  ;;  %v526_v17 = vsel %vm522_vm1, %v517_v4, %v518_v0  ;;  %v1420_v35 = vpop.f32.mrf.mxu1 }
 0x113   :  { %v193_v58 = vpop.f32.mrf.mxu0  ;;  %v551_v33 = vsel %vm1809_vm3, 0.0, %v526_v17 }
 0x114   :  { %v530_v5 = vsel %vm522_vm1, %v521_v57, %v514_v60  ;;  %v519_v23 = vrot.slane %v193_v58, 7  ;;  %v523_v36 = vsel %vm522_vm1, %v520_v26, %v521_v57  ;;  %v608_v48 = vadd.f32 %v551_v33, %v288_v15  ;;  %v291_v60 = vpop.f32.mrf.mxu1 }
 0x115   :  { %v1431_v62 = vpop.f32.mrf.mxu0  ;;  %v547_v14 = vsel %vm1802_vm2, 0.0, %v530_v5  ;;  %v611_v54 = vadd.f32 %v1420_v35, %v523_v36  ;;  %v1564_v36 = vld [vmem:[#allocation7 + $0xa8] sm:$0xff]  }
 0x116   :  { %v565_v19 = vrot.slane %v1431_v62, 1  ;;  %v604_v32 = vadd.f32 %v547_v14, %v272_v46  ;;  %v524_v42 = vsel %vm522_vm1, %v519_v23, %v520_v26  ;;  %v525_v55 = vsel %vm522_vm1, %v518_v0, %v519_v23 }
 0x117   :  { %v370_v6 = vpop.f32.mrf.mxu0  ;;  %v610_v59 = vadd.f32 %v1419_v1, %v524_v42  ;;  %v609_v11 = vadd.f32 %v525_v55, %v291_v60  ;;  %v1571_v42 = vld [vmem:[#allocation8 + $0x8] sm:$0xff]  }
 0x118   :  { %v563_v27 = vrot.slane %v370_v6, 1 }
 0x119   :  { %v1432_v12 = vpop.f32.mrf.mxu0 }
 0x11a   :  { %v566_v20 = vrot.slane %v1432_v12, 1 }
 0x11b   :  { %v373_v24 = vpop.f32.mrf.mxu0 }
 0x11c   :  { %v576_v28 = vsel %vm571_vm4, %v565_v19, %v566_v20  ;;  %v564_v29 = vrot.slane %v373_v24, 1 }
 0x11d   :  { %v1435_v34 = vpop.f32.mrf.mxu0  ;;  %v614_v43 = vadd.f32 %v606_v30, %v576_v28 }
 0x11e   :  { %v577_v37 = vsel %vm571_vm4, %v564_v29, %v565_v19  ;;  %v578_v38 = vsel %vm571_vm4, %v563_v27, %v564_v29  ;;  %v569_v51 = vrot.slane %v1435_v34, 1  ;;  %v1563_v29 = vld [vmem:[#allocation7 + $0xb0] sm:$0xff]  }
 0x11f   :  { %v612_v44 = vadd.f32 %v604_v32, %v578_v38  ;;  %v613_v45 = vadd.f32 %v605_v31, %v577_v37  ;;  %v386_v46 = vpop.f32.mrf.mxu0  ;;  %v629_v63 = vadd.f32 %v1286_v49, %v614_v43  ;;  %v1569_v32 = vld [vmem:[#allocation8 + $0x10] sm:$0xff]  }
 0x120   :  { %v567_v52 = vrot.slane %v386_v46, 1  ;;  %v1570_v46 = vld [vmem:[#allocation7 + $0x88] sm:$0xff]  }
 0x121   :  { %v1436_v56 = vpop.f32.mrf.mxu0  ;;  %v627_v57 = vadd.f32 %v1286_v49, %v612_v44  ;;  %v628_v58 = vadd.f32 %v1286_v49, %v613_v45  ;;  %v637_v24 = vmax.f32 %v629_v63, 0.0  ;;  %v1565_v44 = vld [vmem:[#allocation7 + $0xa0] sm:$0xff]  }
 0x122   :  { %v575_v61 = vsel %vm571_vm4, %v566_v20, %v567_v52  ;;  %v570_v62 = vrot.slane %v1436_v56, 1  ;;  %v1573_v45 = vld [vmem:[#allocation8] sm:$0xff]  }
 0x123   :  { %v599_v3 = vsel %vm1834_vm5, 0.0, %v575_v61  ;;  %v389_v4 = vpop.f32.mrf.mxu0  ;;  %v635_v5 = vmax.f32 %v627_v57, 0.0  ;;  %v636_v6 = vmax.f32 %v628_v58, 0.0 }
 0x124   :  { %v615_v7 = vadd.f32 %v607_v47, %v599_v3  ;;  %v572_v0 = vsel %vm571_vm4, %v569_v51, %v570_v62  ;;  %v579_v1 = vsel %vm571_vm4, %v570_v62, %v563_v27  ;;  %v568_v10 = vrot.slane %v389_v4, 1  ;;  %v1572_v47 = vld [vmem:[#allocation7 + $0x80] sm:$0xff]  }
 0x125   :  { %v603_v12 = vsel %vm1843_vm6, 0.0, %v579_v1  ;;  %v618_v13 = vadd.f32 %v610_v59, %v572_v0  ;;  %v643_v14 = vpack.c.bf16 %v636_v6, %v635_v5 }
 0x126   :  { %v630_v15 = vadd.f32 %v1286_v49, %v615_v7  ;;  %v619_v17 = vadd.f32 %v611_v54, %v603_v12  ;;  %v573_v19 = vsel %vm571_vm4, %v568_v10, %v569_v51  ;;  %v574_v20 = vsel %vm571_vm4, %v567_v52, %v568_v10 }
 0x127   :  { %v616_v21 = vadd.f32 %v608_v48, %v574_v20  ;;  %v617_v23 = vadd.f32 %v609_v11, %v573_v19  ;;  %1453 = vmatprep.mubr.bf16.mxu1 %v643_v14  ;;  %1477 = vmatprep.mubr.bf16.mxu0 %v643_v14  ;;  %v633_v30 = vadd.f32 %v1286_v49, %v618_v13 }
 0x128   :  { %v638_v25 = vmax.f32 %v630_v15, 0.0  ;;  %v634_v31 = vadd.f32 %v1286_v49, %v619_v17 }
 0x129   :  { %v631_v26 = vadd.f32 %v1286_v49, %v616_v21  ;;  %v632_v27 = vadd.f32 %v1286_v49, %v617_v23  ;;  %v641_v37 = vmax.f32 %v633_v30, 0.0 }
 0x12a   :  { %v644_v28 = vpack.c.bf16 %v638_v25, %v637_v24  ;;  %v642_v38 = vmax.f32 %v634_v31, 0.0 }
 0x12b   :  { %v639_v33 = vmax.f32 %v631_v26, 0.0  ;;  %v640_v34 = vmax.f32 %v632_v27, 0.0 }
 0x12c   :  { %1454 = vmatmul.mubr.bf16.vlgmr.msra.gmra.mxu1 %v644_v28  ;;  %1478 = vmatmul.mubr.bf16.vlgmr.msra.gmra.mxu0 %v644_v28  ;;  %v646_v43 = vpack.c.bf16 %v642_v38, %v641_v37  ;;  %v1905_v38 = vld [vmem:[%s1954_s6] ss:$0 sm:$0xff]  ;;  %s1248_s6 = sshll.u32 %s1690_s4, 4  ;;  %s1249_s6 = int_to_ptr.vmem [resolvable:$true] %s1248_s6 }
 0x12d   :  { %1486 = vmatpush3.bf16.msra.mxu1 %v1787_v40  ;;  %v645_v35 = vpack.c.bf16 %v640_v34, %v639_v33  ;;  %1510 = vmatpush3.bf16.msra.mxu0 %v1790_v41  ;;  %v1566_v40 = vld [vmem:[#allocation7 + $0x98] sm:$0xff]   ;;  %v1568_v41 = vld [vmem:[#allocation7 + $0x90] sm:$0xff]   ;;  %s1654_s26 = scalar_lea.vmem %s1249_s6, 1024  ;;  %p1659_p7 = scmp.lt.s32.totalorder %s1249_s6, %s1249_s6 }
 0x12e   :  { %1487 = vmatprep.subr.bf16.mxu1 %v1563_v29  ;;  %1511 = vmatprep.subr.bf16.mxu0 %v1569_v32  ;;  %p1655_p6 = scmp.ne.s32.totalorder %s1249_s6, %s1654_s26  ;;  %p1660_p8 = scmp.lt.s32.totalorder %s1654_s26, %s1654_s26 }
 0x12f   :  { %1457 = vmatprep.mubr.bf16.mxu1 %v645_v35  ;;  %1481 = vmatprep.mubr.bf16.mxu0 %v645_v35 }
 0x130   :  { %p1661_p9 = por %p1660_p8, %p1659_p7 }
 0x131   :  { %1488 = vmatpush3.bf16.msra.mxu1 %v1563_v29  ;;  %1512 = vmatpush3.bf16.msra.mxu0 %v1569_v32 }
 0x132   :  { %1489 = vmatprep.subr.bf16.mxu1 %v1564_v36  ;;  %1513 = vmatprep.subr.bf16.mxu0 %v1571_v42  ;;  %p1662_p10 = pnand %p1661_p9, %p1655_p6 }
 0x134   :  { %1458 = vmatmul.mubr.bf16.gmra.mxu1 %v646_v43  ;;  %1482 = vmatmul.mubr.bf16.gmra.mxu0 %v646_v43 }
 0x135   :  { %1490 = vmatpush3.bf16.msra.mxu1 %v1564_v36  ;;  %1501 = vmatprep.mubr.bf16.mxu1 %v643_v14 }
 0x136   :  { %1491 = vmatprep.subr.bf16.mxu1 %v1565_v44  ;;  %1514 = vmatpush3.bf16.msra.mxu0 %v1571_v42 }
 0x137   :  { %1515 = vmatprep.subr.bf16.mxu0 %v1573_v45  ;;  %1517 = vmatprep.mubr.msk.bf16.mxu0 %vm127_vm0, %v1755_v9 }
 0x139   :  { %1492 = vmatpush3.bf16.msra.mxu1 %v1565_v44 }
 0x13a   :  { %1493 = vmatprep.subr.bf16.mxu1 %v1566_v40  ;;  %1516 = vmatpush3.bf16.msra.mxu0 %v1573_v45 }
 0x13d   :  { %1494 = vmatpush3.bf16.msra.mxu1 %v1566_v40  ;;  %1518 = vmatmul.mubr.msk.bf16.vlgmr.msra.gmra.mxu0 %vm127_vm0, %v1761_v16 }
 0x13e   :  { %1495 = vmatprep.subr.bf16.mxu1 %v1568_v41  ;;  %1521 = vmatprep.mubr.msk.bf16.mxu0 %vm127_vm0, %v1763_v18 }
 0x141   :  { %1496 = vmatpush3.bf16.msra.mxu1 %v1568_v41 }
 0x142   :  { %1497 = vmatprep.subr.bf16.mxu1 %v1570_v46 }
 0x145   :  { %1498 = vmatpush3.bf16.msra.mxu1 %v1570_v46  ;;  %1522 = vmatmul.mubr.msk.bf16.gmra.mxu0 %vm127_vm0, %v1773_v22 }
 0x146   :  { %1499 = vmatprep.subr.bf16.mxu1 %v1572_v47 }
 0x149   :  { %1500 = vmatpush3.bf16.msra.mxu1 %v1572_v47 }
 0x14c   :  { %1502 = vmatmul.mubr.bf16.vlgmr.msra.gmra.mxu1 %v644_v28 }
 0x14d   :  { %1505 = vmatprep.mubr.bf16.mxu1 %v645_v35 }
 0x154   :  { %1506 = vmatmul.mubr.bf16.gmra.mxu1 %v646_v43 }
 0x1ec   :  { %v1479_v9 = vpop.f32.mrf.mxu0  ;;  %v1455_v48 = vpop.f32.mrf.mxu1 }
 0x1ed   :  { %v1038_v1 = vrot.slane %v1455_v48, 7 }
 0x1ee   :  { %v875_v16 = vpop.f32.mrf.mxu0  ;;  %v745_v52 = vpop.f32.mrf.mxu1 }
 0x1ef   :  { %v1036_v7 = vrot.slane %v745_v52, 7 }
 0x1f0   :  { %v1480_v49 = vpop.f32.mrf.mxu0  ;;  %v1456_v18 = vpop.f32.mrf.mxu1 }
 0x1f1   :  { %v1039_v10 = vrot.slane %v1456_v18, 7 }
 0x1f2   :  { %v878_v54 = vpop.f32.mrf.mxu0  ;;  %v748_v57 = vpop.f32.mrf.mxu1 }
 0x1f3   :  { %v1037_v4 = vrot.slane %v748_v57, 7  ;;  %v1048_v26 = vsel %vm522_vm1, %v1038_v1, %v1039_v10 }
 0x1f4   :  { %v1483_v55 = vpop.f32.mrf.mxu0  ;;  %v1459_v59 = vpop.f32.mrf.mxu1  ;;  %v1087_v44 = vadd.f32 %v1480_v49, %v1048_v26 }
 0x1f5   :  { %v1049_v13 = vsel %vm522_vm1, %v1037_v4, %v1038_v1  ;;  %v1050_v14 = vsel %vm522_vm1, %v1036_v7, %v1037_v4  ;;  %v1042_v21 = vrot.slane %v1459_v59, 7 }
 0x1f6   :  { %v891_v56 = vpop.f32.mrf.mxu0  ;;  %v761_v51 = vpop.f32.mrf.mxu1  ;;  %v1086_v27 = vadd.f32 %v1479_v9, %v1049_v13  ;;  %v1085_v28 = vadd.f32 %v1050_v14, %v878_v54 }
 0x1f7   :  { %v1040_v5 = vrot.slane %v761_v51, 7 }
 0x1f8   :  { %v1484_v58 = vpop.f32.mrf.mxu0  ;;  %v1460_v61 = vpop.f32.mrf.mxu1 }
 0x1f9   :  { %v1043_v63 = vrot.slane %v1460_v61, 7  ;;  %v1047_v15 = vsel %vm522_vm1, %v1039_v10, %v1040_v5 }
 0x1fa   :  { %v894_v60 = vpop.f32.mrf.mxu0  ;;  %v764_v3 = vpop.f32.mrf.mxu1  ;;  %v1056_v29 = vsel %vm1809_vm3, 0.0, %v1047_v15 }
 0x1fb   :  { %v1051_v11 = vsel %vm522_vm1, %v1043_v63, %v1036_v7  ;;  %v1041_v19 = vrot.slane %v764_v3, 7  ;;  %v1044_v31 = vsel %vm522_vm1, %v1042_v21, %v1043_v63  ;;  %v1088_v45 = vadd.f32 %v1056_v29, %v891_v56 }
 0x1fc   :  { %v1052_v23 = vsel %vm1802_vm2, 0.0, %v1051_v11  ;;  %v1091_v46 = vadd.f32 %v1484_v58, %v1044_v31 }
 0x1fd   :  { %v1519_v22 = vpop.f32.mrf.mxu0  ;;  %v1084_v36 = vadd.f32 %v1052_v23, %v875_v16  ;;  %v1045_v8 = vsel %vm522_vm1, %v1041_v19, %v1042_v21  ;;  %v1046_v37 = vsel %vm522_vm1, %v1040_v5, %v1041_v19 }
 0x1fe   :  { %v1090_v52 = vadd.f32 %v1483_v55, %v1045_v8  ;;  %v1089_v54 = vadd.f32 %v1046_v37, %v894_v60  ;;  %v1205_v18 = vadd.f32 %v1519_v22, %v1905_v38 }
 0x1ff   :  { %v1196_v62 = vpop.f32.mrf.mxu0 }
 0x200   :  { %v1197_v56 = vadd.f32 %v1905_v38, %v1196_v62 }
 0x201   :  { %v1873_v6 = vpop.f32.mrf.mxu0 }
 0x202   :  { %v1208_v53 = vadd.f32 %v1873_v6, %v1905_v38 }
 0x203   :  { %v1199_v17 = vpop.f32.mrf.mxu0 }
 0x204   :  { %v1200_v3 = vadd.f32 %v1905_v38, %v1199_v17 }
 0x205   :  { %v1523_v35 = vpop.f32.mrf.mxu0 }
 0x206   :  { %v1221_v29 = vadd.f32 %v1523_v35, %v1905_v38 }
 0x207   :  { %v1212_v59 = vpop.f32.mrf.mxu0 }
 0x20c   :  { %v1503_v0 = vpop.f32.mrf.mxu1 }
 0x20d   :  { %v1062_v24 = vrot.slane %v1503_v0, 1 }
 0x20e   :  { %v1005_v12 = vpop.f32.mrf.mxu1 }
 0x20f   :  { %v1060_v32 = vrot.slane %v1005_v12, 1  ;;  %v1524_v12 = vpop.f32.mrf.mxu0 }
 0x210   :  { %v1504_v20 = vpop.f32.mrf.mxu1 }
 0x211   :  { %v1063_v25 = vrot.slane %v1504_v20, 1 }
 0x212   :  { %v1008_v30 = vpop.f32.mrf.mxu1 }
 0x213   :  { %v1072_v33 = vsel %vm571_vm4, %v1062_v24, %v1063_v25  ;;  %v1061_v34 = vrot.slane %v1008_v30, 1 }
 0x214   :  { %v1094_v42 = vadd.f32 %v1086_v27, %v1072_v33  ;;  %v1507_v43 = vpop.f32.mrf.mxu1  ;;  %v1213_v33 = vadd.f32 %v1905_v38, %v1212_v59 }
 0x215   :  { %v1073_v40 = vsel %vm571_vm4, %v1061_v34, %v1062_v24  ;;  %v1074_v41 = vsel %vm571_vm4, %v1060_v32, %v1061_v34  ;;  %v1066_v58 = vrot.slane %v1507_v43, 1 }
 0x216   :  { %v1109_v47 = vadd.f32 %v1896_v2, %v1094_v42  ;;  %v1092_v9 = vadd.f32 %v1084_v36, %v1074_v41  ;;  %v1093_v48 = vadd.f32 %v1085_v28, %v1073_v40  ;;  %v1021_v16 = vpop.f32.mrf.mxu1  ;;  %v1215_v28 = vpop.f32.mrf.mxu0  ;;  %v1224_v36 = vadd.f32 %v1524_v12, %v1905_v38 }
 0x217   :  { %v1064_v57 = vrot.slane %v1021_v16, 1  ;;  %v1216_v42 = vadd.f32 %v1905_v38, %v1215_v28 }
 0x218   :  { %v1117_v49 = vmax.f32 %v1109_v47, 0.0  ;;  %v1107_v51 = vadd.f32 %v1896_v2, %v1092_v9  ;;  %v1108_v61 = vadd.f32 %v1896_v2, %v1093_v48  ;;  %v1508_v63 = vpop.f32.mrf.mxu1 }
 0x219   :  { %v1071_v4 = vsel %vm571_vm4, %v1063_v25, %v1064_v57  ;;  %v1067_v55 = vrot.slane %v1508_v63, 1 }
 0x21a   :  { %v1229_v60 = vadd.f32 %v1205_v18, %v1117_v49  ;;  %v1115_v5 = vmax.f32 %v1107_v51, 0.0  ;;  %v1116_v22 = vmax.f32 %v1108_v61, 0.0  ;;  %v1079_v7 = vsel %vm1834_vm5, 0.0, %v1071_v4  ;;  %v1024_v0 = vpop.f32.mrf.mxu1 }
 0x21b   :  { %v1095_v62 = vadd.f32 %v1087_v44, %v1079_v7  ;;  %v1068_v1 = vsel %vm571_vm4, %v1066_v58, %v1067_v55  ;;  %v1075_v10 = vsel %vm571_vm4, %v1067_v55, %v1060_v32  ;;  %v1065_v11 = vrot.slane %v1024_v0, 1 }
 0x21c   :  { %1237 = vst [vmem:[#allocation10 + $0x10] sm:$0xff] %v1229_v60  ;;  %v1227_v13 = vadd.f32 %v1197_v56, %v1115_v5  ;;  %v1228_v14 = vadd.f32 %v1200_v3, %v1116_v22  ;;  %v1083_v15 = vsel %vm1843_vm6, 0.0, %v1075_v10  ;;  %v1098_v17 = vadd.f32 %v1090_v52, %v1068_v1 }
 0x21d   :  { %v1110_v39 = vadd.f32 %v1896_v2, %v1095_v62  ;;  %v1069_v19 = vsel %vm571_vm4, %v1065_v11, %v1066_v58  ;;  %v1070_v20 = vsel %vm571_vm4, %v1064_v57, %v1065_v11  ;;  %v1099_v21 = vadd.f32 %v1091_v46, %v1083_v15 }
 0x21e   :  { %1235 = vst [vmem:[#allocation10] sm:$0xff] %v1227_v13  ;;  %1236 = vst [vmem:[#allocation10 + $0x8] sm:$0xff] %v1228_v14  ;;  %v1113_v23 = vadd.f32 %v1896_v2, %v1098_v17  ;;  %v1096_v24 = vadd.f32 %v1088_v45, %v1070_v20  ;;  %v1097_v25 = vadd.f32 %v1089_v54, %v1069_v19 }
 0x21f   :  { %v1118_v26 = vmax.f32 %v1110_v39, 0.0  ;;  %v1114_v27 = vadd.f32 %v1896_v2, %v1099_v21 }
 0x220   :  { %v1121_v30 = vmax.f32 %v1113_v23, 0.0  ;;  %v1111_v50 = vadd.f32 %v1896_v2, %v1096_v24  ;;  %v1112_v31 = vadd.f32 %v1896_v2, %v1097_v25 }
 0x221   :  { %v1230_v32 = vadd.f32 %v1208_v53, %v1118_v26  ;;  %v1122_v34 = vmax.f32 %v1114_v27, 0.0 }
 0x222   :  { %v1233_v6 = vadd.f32 %v1221_v29, %v1121_v30  ;;  %v1119_v8 = vmax.f32 %v1111_v50, 0.0  ;;  %v1120_v37 = vmax.f32 %v1112_v31, 0.0 }
 0x223   :  { %1238 = vst [vmem:[#allocation10 + $0x18] sm:$0xff] %v1230_v32  ;;  %v1234_v35 = vadd.f32 %v1224_v36, %v1122_v34 }
 0x224   :  { %1241 = vst [vmem:[#allocation10 + $0x30] sm:$0xff] %v1233_v6  ;;  %v1231_v43 = vadd.f32 %v1213_v33, %v1119_v8  ;;  %v1232_v44 = vadd.f32 %v1216_v42, %v1120_v37 }
 0x225   :  { %1242 = vst [vmem:[#allocation10 + $0x38] sm:$0xff] %v1234_v35 }
 0x226   :  { %1239 = vst [vmem:[#allocation10 + $0x20] sm:$0xff] %v1231_v43  ;;  %1240 = vst [vmem:[#allocation10 + $0x28] sm:$0xff] %v1232_v44 }
 0x227   :  { %1665 = shalt.err (!%p1662_p10)
}
 0x228   :  { %1254 = dma.vmem_to_hbm [thread:$0]  %s1249_s6, 1024, %s1955_s7, [#allocation4], %s1686_s11, %s1686_s11, %s1687_s12  }
 0x229   :  { %1680 = dma.done.wait [#allocation4], 1024  }
 0x22a   :  { %1681 = vsyncadd [#allocation4], 4294966272 }
 0x22b   :  { %1258 = vsyncpa [#allocation3], 1 }
 0x22c   :  { %1259 = vsyncpa [#allocation6], 1 }
 0x22d   :  { %1260 = vsyncpa [#allocation9], 1 }
 0x22e   :  { %1261 = vsyncpa [#allocation4], 1 }

</bundles_post_ra>
